<compile_context>
chip_gen: v7x
topology: tpu7x:2x2x1
jax: 0.10.0
libtpu: 0.0.40
codegen_flags: <defaults>
</compile_context>

<pallas_src>
import functools
import math

import jax
import jax.numpy as jnp
from jax import lax
from jax.experimental import pallas as pl
from jax.experimental.pallas import tpu as pltpu


def _round_up(n, m):
    return ((n + m - 1) // m) * m


def _vmem_limit_bytes(est):
    """Generation-aware scoped-VMEM budget (bytes)."""
    cap = 64 * 2 ** 20  # conservative fallback (treat unknown chips like v7x)
    try:
        info = pltpu.get_tpu_info()
        cap = int(getattr(info, "vmem_capacity_bytes", cap)) or cap
    except Exception:
        pass
    if cap <= 64 * 2 ** 20:
        budget = cap - 12 * 2 ** 20          # v7x: leave compiler headroom
    else:
        budget = min(cap - 16 * 2 ** 20, 112 * 2 ** 20)   # v5e / v6e
    budget = max(budget, 32 * 2 ** 20)
    return int(min(budget, max(32 * 2 ** 20, 2 * est)))


# ---------------------------------------------------------------------------
# Pass 1: K / V projection (computed once per key tile, bf16 to HBM).
# ---------------------------------------------------------------------------
def _kv_proj_kernel(y_ref, wk_ref, bk_ref, wv_ref, bv_ref, k_ref, v_ref):
    y = y_ref[...]
    k_ref[...] = (jnp.dot(y, wk_ref[...], preferred_element_type=jnp.float32)
                  + bk_ref[...]).astype(k_ref.dtype)
    v_ref[...] = (jnp.dot(y, wv_ref[...], preferred_element_type=jnp.float32)
                  + bv_ref[...]).astype(v_ref.dtype)


def _kv_projection(yp, wk, bk, wv, bv, tk):
    B, Syp, Dp = yp.shape
    Hp = wk.shape[1]
    grid = (B, Syp // tk)

    est = (2 * tk * Dp * 2                      # y tiles (double buffered)
           + 2 * 2 * tk * Hp * 2                # k / v output tiles
           + 2 * (2 * Dp * Hp * 2 + 2 * Hp * 4)  # weights / biases
           + 2 * tk * Hp * 4)                   # f32 temporaries

    cost = pl.CostEstimate(
        flops=int(2 * 2 * B * Syp * Dp * Hp),
        transcendentals=0,
        bytes_accessed=int(B * Syp * Dp * 2 + 2 * Dp * Hp * 2
                           + 2 * Hp * 4 + 2 * B * Syp * Hp * 2))

    out_spec = pl.BlockSpec((pl.Squeezed(), tk, Hp), lambda b, i: (b, i, 0))
    return pl.pallas_call(
        _kv_proj_kernel,
        out_shape=(jax.ShapeDtypeStruct((B, Syp, Hp), jnp.bfloat16),
                   jax.ShapeDtypeStruct((B, Syp, Hp), jnp.bfloat16)),
        grid=grid,
        in_specs=[
            pl.BlockSpec((pl.Squeezed(), tk, Dp), lambda b, i: (b, i, 0)),  # y
            pl.BlockSpec((Dp, Hp), lambda b, i: (0, 0)),                    # wk
            pl.BlockSpec((1, Hp), lambda b, i: (0, 0)),                     # bk
            pl.BlockSpec((Dp, Hp), lambda b, i: (0, 0)),                    # wv
            pl.BlockSpec((1, Hp), lambda b, i: (0, 0)),                     # bv
        ],
        out_specs=(out_spec, out_spec),
        compiler_params=pltpu.CompilerParams(
            dimension_semantics=("parallel", "parallel"),
            vmem_limit_bytes=_vmem_limit_bytes(est)),
        cost_estimate=cost,
    )(yp, wk, bk, wv, bv)


# ---------------------------------------------------------------------------
# Pass 2: flash-style attention + (split) output projection.
# ---------------------------------------------------------------------------
def _bidir_attn_kernel(x_ref, wq_ref, bq_ref, k_ref, v_ref,
                       woq_ref, woc_ref, bo_ref, out_ref,
                       q_sc, m_sc, l_sc, acc_sc,
                       *, tile_k, seq_y, mask_keys):
    kv = pl.program_id(2)

    # Once per (batch, query tile): query projection + online-softmax init.
    @pl.when(kv == 0)
    def _init():
        q = jnp.dot(x_ref[...], wq_ref[...],
                    preferred_element_type=jnp.float32) + bq_ref[...]
        q_sc[...] = q.astype(q_sc.dtype)           # bf16 (MXU input dtype)
        m_sc[...] = jnp.full_like(m_sc, -jnp.inf)
        l_sc[...] = jnp.zeros_like(l_sc)
        acc_sc[...] = jnp.zeros_like(acc_sc)

    # Scores: contract q[tq,Hp] with pre-projected, pre-scaled k[tk,Hp] over Hp.
    q = q_sc[...]
    s = lax.dot_general(q, k_ref[...],
                        dimension_numbers=(((1,), (1,)), ((), ())),
                        preferred_element_type=jnp.float32)
    if mask_keys:  # static: only emitted when Sy was padded to a tile multiple
        key_ids = lax.broadcasted_iota(jnp.int32, s.shape, 1) + kv * tile_k
        s = jnp.where(key_ids < seq_y, s, -1e30)

    # Online softmax update (f32).
    m_prev = m_sc[...]
    m_new = jnp.maximum(m_prev, jnp.max(s, axis=-1, keepdims=True))
    alpha = jnp.exp(m_prev - m_new)
    p = jnp.exp(s - m_new)
    l_sc[...] = alpha * l_sc[...] + jnp.sum(p, axis=-1, keepdims=True)
    acc_sc[...] = alpha * acc_sc[...] + jnp.dot(
        p.astype(jnp.bfloat16), v_ref[...], preferred_element_type=jnp.float32)
    m_sc[...] = m_new

    # Finalize: normalize context and apply the (split) output projection.
    # output_layer(cat([q, ctx], -1)) == q @ Wo[:, :H].T + ctx @ Wo[:, H:].T + bo
    @pl.when(kv == pl.num_programs(2) - 1)
    def _finalize():
        inv_l = pl.reciprocal(l_sc[...], approx=True)
        ctx = acc_sc[...] * inv_l
        out = (jnp.dot(q_sc[...], woq_ref[...],
                       preferred_element_type=jnp.float32)
               + jnp.dot(ctx.astype(jnp.bfloat16), woc_ref[...],
                         preferred_element_type=jnp.float32)
               + bo_ref[...])
        out_ref[...] = out.astype(out_ref.dtype)


def bidir_attention(x, y, params, hidden_size, *, tile_q=256, tile_k=256):
    """x: [B, Sx, D], y: [B, Sy, D]; params: dict of pre-transposed weights."""
    B, Sx, D = x.shape
    By, Sy, Dy = y.shape
    assert By == B and Dy == D
    H = hidden_size
    out_dtype = x.dtype

    # Lane-dense feature dims; tile / pad the sequence dims (16 = bf16 sublane tile).
    Dp = _round_up(D, 128)
    Hp = _round_up(H, 128)
    tq = tile_q if Sx >= tile_q else _round_up(Sx, 16)
    tk = tile_k if Sy >= tile_k else _round_up(Sy, 16)
    Sxp = _round_up(Sx, tq)
    Syp = _round_up(Sy, tk)
    mask_keys = (Syp != Sy)

    # 1/sqrt(H) folded into the KEY projection (exact; q stays unscaled so the
    # output-layer q-branch matches the reference).
    scale = 1.0 / math.sqrt(H)

    def pad2(w, r, c):
        return jnp.pad(w, ((0, r - w.shape[0]), (0, c - w.shape[1])))

    # Weights pre-transposed to (in, out); bf16 for the MXU, biases stay f32.
    wq = pad2(params["wq_t"], Dp, Hp).astype(jnp.bfloat16)
    wk = pad2(params["wk_t"] * scale, Dp, Hp).astype(jnp.bfloat16)
    wv = pad2(params["wv_t"], Dp, Hp).astype(jnp.bfloat16)
    woq = pad2(params["woq_t"], Hp, Dp).astype(jnp.bfloat16)
    woc = pad2(params["woc_t"], Hp, Dp).astype(jnp.bfloat16)
    bq = pad2(params["bq"], 1, Hp).astype(jnp.float32)
    bk = pad2(params["bk"] * scale, 1, Hp).astype(jnp.float32)
    bv = pad2(params["bv"], 1, Hp).astype(jnp.float32)
    bo = pad2(params["bo"], 1, Dp).astype(jnp.float32)

    xp = jnp.pad(x, ((0, 0), (0, Sxp - Sx), (0, Dp - D))).astype(jnp.bfloat16)
    yp = jnp.pad(y, ((0, 0), (0, Syp - Sy), (0, Dp - D))).astype(jnp.bfloat16)

    # ---- Pass 1: K/V once per key tile (removes per-query-tile recompute). ----
    k_bf, v_bf = _kv_projection(yp, wk, bk, wv, bv, tk)

    # ---- Pass 2: attention. ----
    grid = (B, Sxp // tq, Syp // tk)
    kernel = functools.partial(_bidir_attn_kernel,
                               tile_k=tk, seq_y=Sy, mask_keys=mask_keys)

    w_dh = pl.BlockSpec((Dp, Hp), lambda b, qi, kv: (0, 0))
    w_hd = pl.BlockSpec((Hp, Dp), lambda b, qi, kv: (0, 0))
    b_h = pl.BlockSpec((1, Hp), lambda b, qi, kv: (0, 0))
    b_d = pl.BlockSpec((1, Dp), lambda b, qi, kv: (0, 0))

    bf, f4 = 2, 4
    est = (2 * tq * Dp * bf                                     # x tiles
           + 2 * 2 * tk * Hp * bf                               # k / v tiles
           + 2 * tq * Dp * f4                                   # out tiles
           + 2 * ((Dp * Hp + 2 * Hp * Dp) * bf + (2 * Hp + Dp) * f4)  # weights
           + tq * Hp * bf + tq * Hp * f4 + 2 * tq * f4          # q/acc/m/l scratch
           + 2 * tq * tk * f4 + tq * Dp * f4 + tq * Hp * f4)    # in-kernel temps
    vmem_limit = _vmem_limit_bytes(est)

    nq = Sxp // tq
    cost = pl.CostEstimate(
        flops=int(2 * B * (Sxp * Dp * Hp            # q projection
                           + 2 * Sxp * Syp * Hp     # scores + p@v
                           + 2 * Sxp * Hp * Dp)),   # output projection
        transcendentals=int(B * Sxp * Syp),
        bytes_accessed=int(B * Sxp * Dp * bf
                           + nq * 2 * B * Syp * Hp * bf
                           + (Dp * Hp + 2 * Hp * Dp) * bf + (2 * Hp + Dp) * f4
                           + B * Sxp * Dp * jnp.dtype(out_dtype).itemsize))

    out = pl.pallas_call(
        kernel,
        out_shape=jax.ShapeDtypeStruct((B, Sxp, Dp), out_dtype),
        grid_spec=pltpu.PrefetchScalarGridSpec(
            num_scalar_prefetch=0,
            grid=grid,
            in_specs=[
                pl.BlockSpec((pl.Squeezed(), tq, Dp),
                             lambda b, qi, kv: (b, qi, 0)),              # x
                w_dh, b_h,                                               # query proj
                pl.BlockSpec((pl.Squeezed(), tk, Hp),
                             lambda b, qi, kv: (b, kv, 0)),              # K (scaled)
                pl.BlockSpec((pl.Squeezed(), tk, Hp),
                             lambda b, qi, kv: (b, kv, 0)),              # V
                w_hd, w_hd, b_d,                                         # output proj
            ],
            out_specs=pl.BlockSpec((pl.Squeezed(), tq, Dp),
                                   lambda b, qi, kv: (b, qi, 0)),
            scratch_shapes=[
                pltpu.VMEM((tq, Hp), jnp.bfloat16),  # q tile (bf16, MXU input)
                pltpu.VMEM((tq, 1), jnp.float32),    # running max
                pltpu.VMEM((tq, 1), jnp.float32),    # running sum
                pltpu.VMEM((tq, Hp), jnp.float32),   # context accumulator
            ],
        ),
        compiler_params=pltpu.CompilerParams(
            dimension_semantics=("parallel", "parallel", "arbitrary"),
            vmem_limit_bytes=vmem_limit),
        cost_estimate=cost,
    )(xp, wq, bq, k_bf, v_bf, woq, woc, bo)

    return out[:, :Sx, :D]


# ---------------------------------------------------------------------------
# Parameters / reference / test harness.
# ---------------------------------------------------------------------------
def init_params(key, input_size, hidden_size):
    """Deterministic synthetic parameters (same shapes as the nn.Module)."""
    ks = jax.random.split(key, 8)
    D, H = input_size, hidden_size
    # nn.Linear(in, out): weight [out, in], bias [out].  Store weights transposed.
    wq = jax.random.normal(ks[0], (H, D), jnp.float32) * 0.05
    wk = jax.random.normal(ks[1], (H, D), jnp.float32) * 0.05
    wv = jax.random.normal(ks[2], (H, D), jnp.float32) * 0.05
    wo = jax.random.normal(ks[3], (D, 2 * H), jnp.float32) * 0.05
    bq = jax.random.normal(ks[4], (H,), jnp.float32) * 0.01
    bk = jax.random.normal(ks[5], (H,), jnp.float32) * 0.01
    bv = jax.random.normal(ks[6], (H,), jnp.float32) * 0.01
    bo = jax.random.normal(ks[7], (D,), jnp.float32) * 0.01
    return {
        "wq_t": wq.T, "bq": bq.reshape(1, H),
        "wk_t": wk.T, "bk": bk.reshape(1, H),
        "wv_t": wv.T, "bv": bv.reshape(1, H),
        # output layer split into the [q | context] halves of the concat
        "woq_t": wo[:, :H].T, "woc_t": wo[:, H:].T, "bo": bo.reshape(1, D),
    }


def reference(x, y, params, hidden_size):
    q = x @ params["wq_t"] + params["bq"]
    k = y @ params["wk_t"] + params["bk"]
    v = y @ params["wv_t"] + params["bv"]
    s = (q @ jnp.swapaxes(k, -1, -2)) / math.sqrt(hidden_size)
    p = jax.nn.softmax(s, axis=-1)
    ctx = p @ v
    return q @ params["woq_t"] + ctx @ params["woc_t"] + params["bo"]


if __name__ == "__main__":
    key = jax.random.PRNGKey(0)

    def run_case(B, Sx, Sy, D, H, k, **tiles):
        kx, ky, kp = jax.random.split(k, 3)
        x = jax.random.normal(kx, (B, Sx, D), jnp.float32)
        y = jax.random.normal(ky, (B, Sy, D), jnp.float32)
        params = init_params(kp, D, H)
        out = jax.block_until_ready(bidir_attention(x, y, params, H, **tiles))
        ref = reference(x, y, params, H)
        assert out.shape == (B, Sx, D)
        # bf16 MXU inputs -> loosened tolerance; softmax/reductions stay f32.
        err = float(jnp.max(jnp.abs(out - ref)))
        assert jnp.allclose(out, ref, atol=3e-2, rtol=2e-2), (
            f"mismatch vs reference, max abs err {err}")

    k1, k2, k3 = jax.random.split(key, 3)
    # Tiled flash path: 2x2 (qi, kv) tiles — exercises the online softmax and
    # K/V reuse across query tiles.
    run_case(B=2, Sx=256, Sy=256, D=128, H=128, k=k1, tile_q=128, tile_k=128)
    # Default 256 tiles (MXU-width tiles for v6e/v7x), single kv step.
    run_case(B=2, Sx=256, Sy=256, D=128, H=128, k=k2)
    # Small, unaligned case near the original spec sizes (padding + key mask).
    run_case(B=2, Sx=10, Sy=12, D=32, H=32, k=k3)

    print("KERNEL_OK")
</pallas_src>

<mosaic_0001>
module attributes {stable_mosaic.version = 11 : i64} {
  func.func @_kv_proj_kernel(%arg0: i32, %arg1: i32, %arg2: memref<1x128x128xbf16, #tpu.memory_space<vmem>>, %arg3: memref<128x128xbf16, #tpu.memory_space<vmem>>, %arg4: memref<1x128xf32, #tpu.memory_space<vmem>>, %arg5: memref<128x128xbf16, #tpu.memory_space<vmem>>, %arg6: memref<1x128xf32, #tpu.memory_space<vmem>>, %arg7: memref<1x128x128xbf16, #tpu.memory_space<vmem>>, %arg8: memref<1x128x128xbf16, #tpu.memory_space<vmem>>) attributes {dimension_semantics = [#tpu.dimension_semantics<parallel>, #tpu.dimension_semantics<parallel>], iteration_bounds = array<i64: 2, 2>, scalar_prefetch = 0 : i64, scratch_operands = 0 : i64, tpu.core_type = #tpu.core_type<tc>, window_params = [{transform_indices = @transform_0, window_bounds = array<i64: 1, 128, 128>}, {pipeline_mode = #tpu.pipeline_mode<synchronous>, transform_indices = @transform_1, window_bounds = array<i64: 128, 128>}, {pipeline_mode = #tpu.pipeline_mode<synchronous>, transform_indices = @transform_2, window_bounds = array<i64: 1, 128>}, {pipeline_mode = #tpu.pipeline_mode<synchronous>, transform_indices = @transform_3, window_bounds = array<i64: 128, 128>}, {pipeline_mode = #tpu.pipeline_mode<synchronous>, transform_indices = @transform_4, window_bounds = array<i64: 1, 128>}, {transform_indices = @transform_5, window_bounds = array<i64: 1, 128, 128>}, {transform_indices = @transform_6, window_bounds = array<i64: 1, 128, 128>}]} {
    %c0 = arith.constant 0 : index
    %c0_0 = arith.constant 0 : index
    %c0_1 = arith.constant 0 : index
    %0 = vector.load %arg2[%c0, %c0_0, %c0_1] : memref<1x128x128xbf16, #tpu.memory_space<vmem>>, vector<1x128x128xbf16>
    %1 = vector.shape_cast %0 : vector<1x128x128xbf16> to vector<128x128xbf16>
    %c0_2 = arith.constant 0 : index
    %c0_3 = arith.constant 0 : index
    %2 = vector.load %arg3[%c0_2, %c0_3] : memref<128x128xbf16, #tpu.memory_space<vmem>>, vector<128x128xbf16>
    %cst = arith.constant dense<0.000000e+00> : vector<128x128xf32>
    %3 = tpu.matmul %1, %2, %cst {dimension_numbers = #tpu.dot_dimension_numbers<[1], [0], [0], [1], [0, 0, 1, 1], [], []>} : vector<128x128xbf16>, vector<128x128xbf16>, vector<128x128xf32> -> vector<128x128xf32>
    %c0_4 = arith.constant 0 : index
    %c0_5 = arith.constant 0 : index
    %4 = vector.load %arg4[%c0_4, %c0_5] : memref<1x128xf32, #tpu.memory_space<vmem>>, vector<1x128xf32>
    %5 = vector.broadcast %4 : vector<1x128xf32> to vector<128x128xf32>
    %6 = arith.addf %3, %5 : vector<128x128xf32>
    %7 = arith.truncf %6 : vector<128x128xf32> to vector<128x128xbf16>
    %c0_6 = arith.constant 0 : index
    %c0_7 = arith.constant 0 : index
    %c0_8 = arith.constant 0 : index
    %8 = vector.load %arg7[%c0_6, %c0_7, %c0_8] : memref<1x128x128xbf16, #tpu.memory_space<vmem>>, vector<1x128x128xbf16>
    %9 = vector.shape_cast %8 : vector<1x128x128xbf16> to vector<128x128xbf16>
    %10 = vector.shape_cast %7 : vector<128x128xbf16> to vector<1x128x128xbf16>
    tpu.vector_store %arg7[%c0_6, %c0_7, %c0_8], %10 {strides = array<i32>} : memref<1x128x128xbf16, #tpu.memory_space<vmem>>, vector<1x128x128xbf16>,
    %c0_9 = arith.constant 0 : index
    %c0_10 = arith.constant 0 : index
    %11 = vector.load %arg5[%c0_9, %c0_10] : memref<128x128xbf16, #tpu.memory_space<vmem>>, vector<128x128xbf16>
    %cst_11 = arith.constant dense<0.000000e+00> : vector<128x128xf32>
    %12 = tpu.matmul %1, %11, %cst_11 {dimension_numbers = #tpu.dot_dimension_numbers<[1], [0], [0], [1], [0, 0, 1, 1], [], []>} : vector<128x128xbf16>, vector<128x128xbf16>, vector<128x128xf32> -> vector<128x128xf32>
    %c0_12 = arith.constant 0 : index
    %c0_13 = arith.constant 0 : index
    %13 = vector.load %arg6[%c0_12, %c0_13] : memref<1x128xf32, #tpu.memory_space<vmem>>, vector<1x128xf32>
    %14 = vector.broadcast %13 : vector<1x128xf32> to vector<128x128xf32>
    %15 = arith.addf %12, %14 : vector<128x128xf32>
    %16 = arith.truncf %15 : vector<128x128xf32> to vector<128x128xbf16>
    %c0_14 = arith.constant 0 : index
    %c0_15 = arith.constant 0 : index
    %c0_16 = arith.constant 0 : index
    %17 = vector.load %arg8[%c0_14, %c0_15, %c0_16] : memref<1x128x128xbf16, #tpu.memory_space<vmem>>, vector<1x128x128xbf16>
    %18 = vector.shape_cast %17 : vector<1x128x128xbf16> to vector<128x128xbf16>
    %19 = vector.shape_cast %16 : vector<128x128xbf16> to vector<1x128x128xbf16>
    tpu.vector_store %arg8[%c0_14, %c0_15, %c0_16], %19 {strides = array<i32>} : memref<1x128x128xbf16, #tpu.memory_space<vmem>>, vector<1x128x128xbf16>,
    return
  }
  func.func @transform_0(%arg0: i32, %arg1: i32) -> (i32, i32, i32) {
    %c0_i32 = arith.constant 0 : i32
    %c0_i32_0 = arith.constant 0 : i32
    return %arg0, %arg1, %c0_i32 : i32, i32, i32
  }
  func.func @transform_1(%arg0: i32, %arg1: i32) -> (i32, i32) {
    %c0_i32 = arith.constant 0 : i32
    %c0_i32_0 = arith.constant 0 : i32
    %c0_i32_1 = arith.constant 0 : i32
    return %c0_i32, %c0_i32_0 : i32, i32
  }
  func.func @transform_2(%arg0: i32, %arg1: i32) -> (i32, i32) {
    %c0_i32 = arith.constant 0 : i32
    %c0_i32_0 = arith.constant 0 : i32
    %c0_i32_1 = arith.constant 0 : i32
    return %c0_i32, %c0_i32_0 : i32, i32
  }
  func.func @transform_3(%arg0: i32, %arg1: i32) -> (i32, i32) {
    %c0_i32 = arith.constant 0 : i32
    %c0_i32_0 = arith.constant 0 : i32
    %c0_i32_1 = arith.constant 0 : i32
    return %c0_i32, %c0_i32_0 : i32, i32
  }
  func.func @transform_4(%arg0: i32, %arg1: i32) -> (i32, i32) {
    %c0_i32 = arith.constant 0 : i32
    %c0_i32_0 = arith.constant 0 : i32
    %c0_i32_1 = arith.constant 0 : i32
    return %c0_i32, %c0_i32_0 : i32, i32
  }
  func.func @transform_5(%arg0: i32, %arg1: i32) -> (i32, i32, i32) {
    %c0_i32 = arith.constant 0 : i32
    %c0_i32_0 = arith.constant 0 : i32
    return %arg0, %arg1, %c0_i32 : i32, i32, i32
  }
  func.func @transform_6(%arg0: i32, %arg1: i32) -> (i32, i32, i32) {
    %c0_i32 = arith.constant 0 : i32
    %c0_i32_0 = arith.constant 0 : i32
    return %arg0, %arg1, %c0_i32 : i32, i32, i32
  }
}

</mosaic_0001>

<bundles_post_ra>
// kernel: tpu_custom_call.1
= control target key start
LH: loop header
LB: loop body
LE: loop exit
PB: predicated region body
PF: predicated region fallthrough
CT: control target
= control target key end

     0   :  { %s2185_s0 = inlined_call_operand.hbm [shape: bf16[2,256,128], index: 0, kind: input, shape index: {}]   ;;  %s2186_s1 = inlined_call_operand.hbm [shape: bf16[128,128], index: 1, kind: input, shape index: {}]   ;;  %s2187_s2 = inlined_call_operand.vmem [shape: f32[1,128], index: 2, kind: input, shape index: {}]   ;;  %s2188_s3 = inlined_call_operand.hbm [shape: bf16[128,128], index: 3, kind: input, shape index: {}]   ;;  %s2189_s4 = inlined_call_operand.vmem [shape: f32[1,128], index: 4, kind: input, shape index: {}]   ;;  %s2190_s5 = inlined_call_operand.hbm [shape: bf16[2,256,128], index: 5, kind: output, shape index: {0}]   ;;  %s2191_s6 = inlined_call_operand.hbm [shape: bf16[2,256,128], index: 6, kind: output, shape index: {1}]  }
   0x1   :  { %2205 = sst [smem:[#allocation19_spill]] %s2186_s1 }
   0x2   :  { %2206 = sst [smem:[#allocation20_spill]] %s2188_s3 }
   0x3   :  { %2207 = sst [smem:[#allocation21_spill]] %s2190_s5 }
   0x4   :  { %2208 = sst [smem:[#allocation22_spill]] %s2191_s6 }
   0x5   :  { %12 = vsyncpa [#allocation3], 0 }
   0x6   :  { %14 = vsyncpa [#allocation3 + $0x1], 0 }
   0x7   :  { %15 = vsyncpa [#allocation6], 0 }
   0x8   :  { %16 = vsyncpa [#allocation4], 0 }
   0x9   :  { %18 = vsyncpa [#allocation4 + $0x1], 0 }
   0xa   :  { %19 = vsyncpa [#allocation10], 0 }
   0xb   :  { %21 = vsyncpa [#allocation10 + $0x1], 0  ;;  %s1781_s21 = smov 0   ;;  %s1783_s22 = smov 0  }
   0xc   :  { %s1785_s23 = smov 0   ;;  %s1787_s24 = smov 0  }
   0xd   :  { %s1789_s25 = smov 0   ;;  %s1791_s26 = smov 0  }
   0xe   :  { %s1793_s27 = smov 0   ;;  %s1795_s28 = smov 0  }
   0xf LB: > { %2209 = sst [smem:[#allocation15_spill]] %s1707_s21  ;;  %s1077_s29 = sadd.s32 4294967295, %s1735_s28   ;;  %s1735_s28 = sphi %s1795_s28, %s27_s28   ;;  %s1731_s27 = sphi %s1793_s27, %s2243_s27   ;;  %s1727_s26 = sphi %s1791_s26, %s2242_s26   ;;  %s1723_s25 = sphi %s1789_s25, %s2241_s25   ;;  %s1719_s24 = sphi %s1787_s24, %s2240_s24   ;;  %s1715_s23 = sphi %s1785_s23, %s2239_s23   ;;  %s1711_s22 = sphi %s1783_s22, %s2238_s22   ;;  %s1707_s21 = sphi %s1781_s21, %s2237_s21  }
  0x10   : > { %s1078_s30 = sadd.s32 4294967294, %s1735_s28   ;;  %p61_p0 = scmp.ne.s32.totalorder %s1711_s22, %s1707_s21 }
  0x11   : > { %p1825_p1 = scmp.eq.s32.totalorder %s1077_s29, 0  ;;  %p1829_p2 = scmp.eq.s32.totalorder %s1077_s29, 3 }
  0x12   : > { %p177_p3 = scmp.eq.s32.totalorder %s1078_s30, 3  ;;  %p1079_p5 = scmp.ge.s32.totalorder %s1735_s28, 1 }
  0x13   : > { %s2210_s7 = scalar_select %p1825_p1, 1, 0 }
  0x14   : > { %s2211_s8 = scalar_select %p1829_p2, 1, 0 }
  0x15   : > { %p1835_p4 = por %p1825_p1, %p61_p0  ;;  %p1840_p6 = por %p177_p3, %p61_p0 }
  0x16   : > { %p212_p7 = scmp.lt.s32.totalorder %s1735_s28, 5  ;;  %s1737_s12 = smov [#allocation5]  }
  0x17   : > { %s2212_s9 = scalar_select %p1835_p4, 1, 0 }
  0x18   : > { %s2213_s10 = scalar_select %p1840_p6, 1, 0 }
  0x19   : > { %p1845_p8 = pnand %p1079_p5, %p212_p7  ;;  %s224_s13 = sshll.u32 %s1737_s12, 4  ;;  %s225_s13 = int_to_ptr.vmem [resolvable:$true] %s224_s13 }
  0x1a   : > { %2214 = sst [smem:[#allocation16_spill]] %s2213_s10  ;;  %s1738_s15 = smov [#allocation7]  }
  0x1b   : > { %s2215_s11 = scalar_select %p1845_p8, 1, 0 }
  0x1c   : > { %p1397_p9 = pneg %p1845_p8  ;;  %s240_s16 = sshll.u32 %s1738_s15, 4  ;;  %s1857_s16 = int_to_ptr.vmem [resolvable:$true] %s240_s16 }
  0x1d   : > { %s2217_s1 = sld [smem:[#allocation19_spill]] }
  0x1e   : > { %p1853_p10 = pnand %p1397_p9, %p1825_p1 }
  0x20   : > { %p1517_p12 = pneg %p1853_p10 }
  0x23   : > { %s1515_s19 = scalar_lea.hbm %s2217_s1, 1024 }
  0x24   : > { %p1516_p11 = scmp.ne.s32.totalorder %s2217_s1, %s1515_s19  ;;  %p1522_p3 = scmp.lt.u32.totalorder %s1515_s19, %s2217_s1 }
  0x26   : > { %p1518_p13 = pnand %p1517_p12, %p1516_p11 }
  0x28   : > { %p1519_p0 = pneg %p1518_p13 }
  0x2a   : > { %p1524_p5 = pnand %p1522_p3, %p1519_p0 }
  0x2c   : > { %1527 = shalt.err (!%p1524_p5)
}
  0x2d   : > { %s1528_s15 = scalar_lea.vmem %s225_s13, 1024  ;;  %p1536_p1 = scmp.lt.s32.totalorder %s225_s13, %s225_s13 }
  0x2e   : > { %p1529_p7 = scmp.ne.s32.totalorder %s225_s13, %s1528_s15  ;;  %p1537_p4 = scmp.lt.s32.totalorder %s1528_s15, %s1528_s15 }
  0x30   : > { %p1531_p9 = pnand %p1529_p7, %p1517_p12  ;;  %p1538_p8 = por %p1537_p4, %p1536_p1 }
  0x32   : > { %p1532_p6 = pneg %p1531_p9 }
  0x34   : > { %p1539_p2 = pnand %p1538_p8, %p1532_p6 }
  0x36   : > { %1542 = shalt.err (!%p1539_p2)
}
  0x37   : > { %s2199_s17 = smov 64   ;;  %s2200_s18 = smov 4  }
  0x38   : > { %1400 = dma.hbm_to_vmem [thread:$0]  (!%p1853_p10), %s2217_s1, 1024, %s225_s13, [#allocation6], %s2199_s17, %s2199_s17, %s2200_s18  }
  0x39   : > { %s2218_s3 = sld [smem:[#allocation20_spill]] }
  0x3f   : > { %s1543_s12 = scalar_lea.hbm %s2218_s3, 1024 }
  0x40   : > { %p1544_p1 = scmp.ne.s32.totalorder %s2218_s3, %s1543_s12  ;;  %p1550_p6 = scmp.lt.u32.totalorder %s1543_s12, %s2218_s3 }
  0x42   : > { %p1546_p2 = pnand %p1544_p1, %p1517_p12 }
  0x44   : > { %p1547_p4 = pneg %p1546_p2 }
  0x46   : > { %p1552_p8 = pnand %p1550_p6, %p1547_p4 }
  0x48   : > { %1555 = shalt.err (!%p1552_p8)
}
  0x49   : > { %s1556_s13 = scalar_lea.vmem %s1857_s16, 1024  ;;  %p1564_p3 = scmp.lt.s32.totalorder %s1857_s16, %s1857_s16 }
  0x4a   : > { %p1557_p11 = scmp.ne.s32.totalorder %s1857_s16, %s1556_s13  ;;  %p1565_p5 = scmp.lt.s32.totalorder %s1556_s13, %s1556_s13 }
  0x4c   : > { %p1559_p13 = pnand %p1557_p11, %p1517_p12  ;;  %p1566_p7 = por %p1565_p5, %p1564_p3 }
  0x4e   : > { %p1560_p0 = pneg %p1559_p13 }
  0x50   : > { %p1567_p9 = pnand %p1566_p7, %p1560_p0 }
  0x52   : > { %1570 = shalt.err (!%p1567_p9)
}
  0x53   : > { %1403 = dma.hbm_to_vmem [thread:$0]  (!%p1853_p10), %s2218_s3, 1024, %s1857_s16, [#allocation6], %s2199_s17, %s2199_s17, %s2200_s18  }
  0x54   : > { %s36_s10 = sadd.s32 1, %s1727_s26  ;;  %s39_s14 = sadd.s32 1, %s1731_s27 }
  0x55   : > { %p37_p12 = scmp.ge.s32.totalorder %s36_s10, 2  ;;  %s48_s19 = sadd.s32 1, %s1715_s23 }
  0x56   : > { %p55_p1 = scmp.ne.s32.totalorder %s1715_s23, %s1711_s22  ;;  %p56_p2 = scmp.eq.s32.totalorder %s1735_s28, 0 }
  0x57   : > { %s2245_s10 = smov (%p37_p12, %s36_s10), 0  ;;  %s2247_s14 = smov (!%p37_p12, %s39_s14), %s1731_s27 }
  0x58   : > { %2219 = sst [smem:[#allocation17_spill]] %s2245_s10  ;;  %s44_s20 = ssub.s32 %s1727_s26, %s2245_s10 }
  0x59   : > { %p1923_p4 = por %p56_p2, %p55_p1  ;;  %p41_p10 = scmp.ge.s32.totalorder %s2247_s14, 2 }
  0x5a   : > { %p2221_p6 = scmp.ne.s32.totalorder %s2211_s8, 0  ;;  %p1417_p11 = scmp.lt.s32.totalorder %s1735_s28, 4 }
  0x5b   : > { %s257_s30 = sand.u32 1, %s1715_s23   ;;  %s2249_s14 = smov (%p41_p10, %s2247_s14), 0 }
  0x5c   : > { %p1929_p8 = por %p2221_p6, %p55_p1  ;;  %s1083_s12 = sshll.u32 %s257_s30, 6 }
  0x5d   : > { %s43_s15 = ssub.s32 %s1731_s27, %s2249_s14  ;;  %s1084_s6 = sshll.u32 %s1727_s26, 4 }
  0x5e   : > { %s2222_s16 = scalar_select %p1929_p8, 1, 0 }
  0x5f   : > { %s45_s13 = sor.u32 %s44_s20, %s43_s15  ;;  %s1085_s21 = sshll.u32 %s1731_s27, 5 }
  0x60   : > { %2223 = sst [smem:[#allocation18_spill]] %s2222_s16  ;;  %p46_p13 = scmp.eq.s32.totalorder %s45_s13, 0 }
  0x61   : > { %s267_s17 = sadd.s32 %s1085_s21, %s1084_s6  ;;  %s261_s18 = scalar_lea.vmem [#allocation2], %s1083_s12 }
  0x62   : > { %s270_s8 = sshll.u32 %s261_s18, 4  ;;  %s1086_s3 = sshll.u32 %s267_s17, 6  ;;  %s1944_s8 = int_to_ptr.vmem [resolvable:$true] %s270_s8 }
  0x63   : > { %s1942_s1 = scalar_select %p46_p13, %s1715_s23, %s48_s19  }
  0x64   : > { %s1949_s16 = scalar_lea.hbm %s2185_s0, %s1086_s3  ;;  %p1955_p0 = pnand %p1417_p11, %p1923_p4 }
  0x65   : > { %s1959_s17 = scalar_lea.sflag [#allocation3], %s257_s30  ;;  %s1571_s18 = scalar_lea.hbm %s1949_s16, 1024 }
  0x66   : > { %p1572_p3 = scmp.ne.s32.totalorder %s1949_s16, %s1571_s18  ;;  %p1573_p5 = pneg %p1955_p0 }
  0x67   : > { %s1576_s10 = scalar_lea.hbm %s2185_s0, 4096  ;;  %p1577_p12 = scmp.lt.u32.totalorder %s1949_s16, %s2185_s0 }
  0x68   : > { %p1574_p7 = pnand %p1573_p5, %p1572_p3  ;;  %p1578_p1 = scmp.lt.u32.totalorder %s1576_s10, %s1571_s18 }
  0x69   : > { %p1580_p4 = scmp.lt.u32.totalorder %s1571_s18, %s1949_s16 }
  0x6a   : > { %p1575_p9 = pneg %p1574_p7  ;;  %p1579_p2 = por %p1578_p1, %p1577_p12 }
  0x6c   : > { %p1581_p10 = por %p1580_p4, %p1579_p2 }
  0x6e   : > { %p1582_p6 = pnand %p1581_p10, %p1575_p9 }
  0x70   : > { %1585 = shalt.err (!%p1582_p6)
}
  0x71   : > { %s1586_s30 = scalar_lea.vmem %s1944_s8, 1024  ;;  %s1741_s12 = smov [#allocation2]  }
  0x72   : > { %p1587_p11 = scmp.ne.s32.totalorder %s1944_s8, %s1586_s30  ;;  %s1591_s15 = sshll.u32 %s1741_s12, 4  ;;  %s1592_s15 = int_to_ptr.vmem [resolvable:$false] %s1591_s15 }
  0x73   : > { %s1593_s13 = scalar_lea.vmem %s1592_s15, 2048  ;;  %p1594_p7 = scmp.lt.s32.totalorder %s1944_s8, %s1592_s15 }
  0x74   : > { %p1589_p13 = pnand %p1587_p11, %p1573_p5  ;;  %p1595_p12 = scmp.lt.s32.totalorder %s1593_s13, %s1586_s30 }
  0x76   : > { %p1590_p3 = pneg %p1589_p13  ;;  %p1596_p1 = por %p1595_p12, %p1594_p7 }
  0x78   : > { %p1597_p2 = pnand %p1596_p1, %p1590_p3 }
  0x7a   : > { %1600 = shalt.err (!%p1597_p2)
}
  0x7b   : > { %s2225_s6 = smov 4   ;;  %s2226_s21 = smov 64  }
  0x7c   : > { %1407 = dma.hbm_to_vmem [thread:$0]  (!%p1955_p0), %s1949_s16, 1024, %s1944_s8, %s1959_s17, %s2226_s21, %s2226_s21, %s2225_s6  }
  0x7d   : > { %p2227_p5 = scmp.ne.s32.totalorder %s2215_s11, 0 }
  0x7e   : > { %s1993_s18 = sand.u32 (!%p2227_p5), 1, %s1711_s22   ;;  %p2228_p9 = scmp.ne.s32.totalorder (!%p2227_p5), %s2212_s9, 0 }
  0x7f   : > { %282 = sbr.rel (%p2227_p5) target bundleno = 453 (0x1c5), region = 40  ;;  %s1996_s3 = sshll.u32 (!%p2227_p5), %s1993_s18, 6 }
  0x80   : > { %s285_s20 = scalar_lea.sflag (!%p2227_p5), [#allocation3], %s1993_s18  ;;  %s2000_s5 = scalar_lea.vmem (!%p2227_p5), [#allocation2], %s1996_s3 }
  0x86   : > { %1690 = dma.done.wait (%p2228_p9), %s285_s20, 1024  }
  0x87   : > { %1692 = vsyncadd (%p2228_p9), %s285_s20, 4294966272  ;;  %p2229_p0 = scmp.ne.s32.totalorder %s2210_s7, 0 }
  0x89   : > { %1694 = dma.done.wait (%p2229_p0), [#allocation6], 2048  }
  0x8a   : > { %1696 = vsyncadd (%p2229_p0), [#allocation6], 4294965248  ;;  %v1491_v0 = vld [vmem:[#allocation5] sm:$0xff]   ;;  %v1493_v2 = vld [vmem:[#allocation5 + $0x8] sm:$0xff]   ;;  %s2037_s8 = scalar_lea.vmem [#allocation8], %s1996_s3  ;;  %s2041_s17 = scalar_lea.vmem [#allocation9], %s1996_s3 }
  0x8b   : > { %v1492_v1 = vld [vmem:[#allocation7] sm:$0xff]   ;;  %1319 = vmatprep.subr.bf16.mxu0 %v1491_v0  ;;  %v1494_v3 = vld [vmem:[#allocation7 + $0x8] sm:$0xff]   ;;  %v1495_v4 = vld [vmem:[#allocation5 + $0x10] sm:$0xff]   ;;  %s1153_s10 = sshll.u32 %s1719_s24, 4  ;;  %s1154_s19 = sshll.u32 %s1723_s25, 5 }
  0x8c   : > { %1351 = vmatprep.subr.bf16.mxu1 %v1492_v1  ;;  %1320 = vmatpush3.bf16.msra.mxu0 %v1491_v0  ;;  %v1496_v5 = vld [vmem:[#allocation7 + $0x10] sm:$0xff]   ;;  %v1497_v6 = vld [vmem:[#allocation5 + $0x18] sm:$0xff]   ;;  %v1499_v8 = vld [vmem:[#allocation5 + $0x20] sm:$0xff]   ;;  %s2069_s29 = sadd.s32 %s1154_s19, %s1153_s10  ;;  %s915_s30 = sshll.u32 %s2037_s8, 4  ;;  %s2079_s30 = int_to_ptr.vmem [resolvable:$true] %s915_s30 }
  0x8d   : > { %1352 = vmatpush3.bf16.msra.mxu1 %v1492_v1  ;;  %1321 = vmatprep.subr.bf16.mxu0 %v1493_v2  ;;  %v1498_v7 = vld [vmem:[#allocation7 + $0x18] sm:$0xff]   ;;  %v1500_v9 = vld [vmem:[#allocation7 + $0x20] sm:$0xff]   ;;  %v1501_v10 = vld [vmem:[#allocation5 + $0x28] sm:$0xff]   ;;  %s933_s12 = sshll.u32 %s2041_s17, 4  ;;  %s1155_s24 = sshll.u32 %s2069_s29, 6  ;;  %s2081_s12 = int_to_ptr.vmem [resolvable:$true] %s933_s12 }
  0x8e   : > { %1353 = vmatprep.subr.bf16.mxu1 %v1494_v3  ;;  %v1507_v11 = vld [vmem:[%s2000_s5] sm:$0xff]   ;;  %v1502_v12 = vld [vmem:[#allocation7 + $0x28] sm:$0xff]   ;;  %v1503_v13 = vld [vmem:[#allocation5 + $0x30] sm:$0xff]   ;;  %s2231_s6 = sld [smem:[#allocation21_spill]]  ;;  %s895_s9 = scalar_lea.sflag [#allocation4], %s1993_s18 }
  0x8f   : > { %1335 = vmatprep.mubr.bf16.mxu0 %v1507_v11  ;;  %1367 = vmatprep.mubr.bf16.mxu1 %v1507_v11  ;;  %v1504_v14 = vld [vmem:[#allocation7 + $0x30] sm:$0xff]   ;;  %v1505_v15 = vld [vmem:[#allocation5 + $0x38] sm:$0xff]   ;;  %v1508_v17 = vld [vmem:[%s2000_s5 + $0x8] sm:$0xff]   ;;  %s1601_s11 = scalar_lea.vmem %s2079_s30, 1024  ;;  %s1742_s16 = smov [#allocation8]  }
  0x90   : > { %1322 = vmatpush3.bf16.msra.mxu0 %v1493_v2  ;;  %v1506_v16 = vld [vmem:[#allocation7 + $0x38] sm:$0xff]   ;;  %v1509_v18 = vld [vmem:[%s2000_s5 + $0x10] sm:$0xff]   ;;  %v1511_v20 = vld [vmem:[%s2000_s5 + $0x20] sm:$0xff]   ;;  %p1602_p4 = scmp.ne.s32.totalorder %s2079_s30, %s1601_s11  ;;  %s1605_s10 = sshll.u32 %s1742_s16, 4  ;;  %s1606_s10 = int_to_ptr.vmem [resolvable:$false] %s1605_s10 }
  0x91   : > { %1354 = vmatpush3.bf16.msra.mxu1 %v1494_v3  ;;  %1323 = vmatprep.subr.bf16.mxu0 %v1495_v4  ;;  %v1510_v19 = vld [vmem:[%s2000_s5 + $0x18] sm:$0xff]   ;;  %v1512_v21 = vld [vmem:[%s2000_s5 + $0x28] sm:$0xff]   ;;  %v1513_v22 = vld [vmem:[%s2000_s5 + $0x30] sm:$0xff]   ;;  %s1607_s19 = scalar_lea.vmem %s1606_s10, 2048  ;;  %p1608_p11 = scmp.lt.s32.totalorder %s2079_s30, %s1606_s10 }
  0x92   : > { %1355 = vmatprep.subr.bf16.mxu1 %v1496_v5  ;;  %v1514_v23 = vld [vmem:[%s2000_s5 + $0x38] sm:$0xff]   ;;  %v2021_v25 = vld [vmem:[%s2187_s2] ss:$0 sm:$0xff]  ;;  %s2232_s5 = sld [smem:[#allocation22_spill]]  ;;  %p1603_p10 = pnand %p1602_p4, %p1929_p8 }
  0x93   : > { %v2026_v27 = vld [vmem:[%s2189_s4] ss:$0 sm:$0xff]  ;;  %p1609_p13 = scmp.lt.s32.totalorder %s1607_s19, %s1601_s11 }
  0x94   : > { %1324 = vmatpush3.bf16.msra.mxu0 %v1495_v4  ;;  %s2092_s21 = scalar_lea.hbm %s2231_s6, %s1155_s24  ;;  %p1604_p6 = pneg %p1603_p10 }
  0x95   : > { %1356 = vmatpush3.bf16.msra.mxu1 %v1496_v5  ;;  %1325 = vmatprep.subr.bf16.mxu0 %v1497_v6  ;;  %p1610_p3 = por %p1609_p13, %p1608_p11 }
  0x96   : > { %1357 = vmatprep.subr.bf16.mxu1 %v1498_v7 }
  0x97   : > { %p1611_p7 = pnand %p1610_p3, %p1604_p6 }
  0x98   : > { %1326 = vmatpush3.bf16.msra.mxu0 %v1497_v6  ;;  %s2098_s7 = scalar_lea.hbm %s2232_s5, %s1155_s24 }
  0x99   : > { %1358 = vmatpush3.bf16.msra.mxu1 %v1498_v7  ;;  %1327 = vmatprep.subr.bf16.mxu0 %v1499_v8 }
  0x9a   : > { %1359 = vmatprep.subr.bf16.mxu1 %v1500_v9 }
  0x9c   : > { %1328 = vmatpush3.bf16.msra.mxu0 %v1499_v8 }
  0x9d   : > { %1360 = vmatpush3.bf16.msra.mxu1 %v1500_v9  ;;  %1329 = vmatprep.subr.bf16.mxu0 %v1501_v10 }
  0x9e   : > { %1361 = vmatprep.subr.bf16.mxu1 %v1502_v12 }
  0xa0   : > { %1330 = vmatpush3.bf16.msra.mxu0 %v1501_v10 }
  0xa1   : > { %1362 = vmatpush3.bf16.msra.mxu1 %v1502_v12  ;;  %1331 = vmatprep.subr.bf16.mxu0 %v1503_v13 }
  0xa2   : > { %1363 = vmatprep.subr.bf16.mxu1 %v1504_v14 }
  0xa4   : > { %1332 = vmatpush3.bf16.msra.mxu0 %v1503_v13 }
  0xa5   : > { %1364 = vmatpush3.bf16.msra.mxu1 %v1504_v14  ;;  %1333 = vmatprep.subr.bf16.mxu0 %v1505_v15 }
  0xa6   : > { %1365 = vmatprep.subr.bf16.mxu1 %v1506_v16 }
  0xa8   : > { %1334 = vmatpush3.bf16.msra.mxu0 %v1505_v15 }
  0xa9   : > { %1366 = vmatpush3.bf16.msra.mxu1 %v1506_v16 }
  0xab   : > { %1336 = vmatmul.mubr.bf16.vlgmr.msra.gmra.mrb[0].mxu0 %v1508_v17 }
  0xac   : > { %1368 = vmatmul.mubr.bf16.vlgmr.msra.gmra.mrb[0].mxu1 %v1508_v17  ;;  %1339 = vmatprep.mubr.bf16.mxu0 %v1509_v18 }
  0xad   : > { %1371 = vmatprep.mubr.bf16.mxu1 %v1509_v18 }
  0xb3   : > { %1340 = vmatmul.mubr.bf16.gmra.mrb[4].mxu0 %v1510_v19 }
  0xb4   : > { %1372 = vmatmul.mubr.bf16.gmra.mrb[4].mxu1 %v1510_v19  ;;  %1343 = vmatprep.mubr.bf16.mxu0 %v1511_v20 }
  0xb5   : > { %1375 = vmatprep.mubr.bf16.mxu1 %v1511_v20 }
  0xbb   : > { %1344 = vmatmul.mubr.bf16.gmra.mrb[8].mxu0 %v1512_v21 }
  0xbc   : > { %1376 = vmatmul.mubr.bf16.gmra.mrb[8].mxu1 %v1512_v21  ;;  %1347 = vmatprep.mubr.bf16.mxu0 %v1513_v22 }
  0xbd   : > { %1379 = vmatprep.mubr.bf16.mxu1 %v1513_v22 }
  0xc3   : > { %1348 = vmatmul.mubr.bf16.gmra.mrb[12].mxu0 %v1514_v23 }
  0xc4   : > { %1380 = vmatmul.mubr.bf16.gmra.mrb[12].mxu1 %v1514_v23 }
 0x17e   : > { %v1337_v24 = vpop.f32.mrb[0].mxu0 }
 0x17f   : > { %v1369_v26 = vpop.f32.mrb[0].mxu1  ;;  %v503_v28 = vpop.f32.mrb[1].mxu0  ;;  %v512_v31 = vadd.f32 %v1337_v24, %v2021_v25 }
 0x180   : > { %v751_v29 = vpop.f32.mrb[1].mxu1  ;;  %v1338_v30 = vpop.f32.mrb[2].mxu0  ;;  %v760_v35 = vadd.f32 %v1369_v26, %v2026_v27  ;;  %v504_v36 = vadd.f32 %v2021_v25, %v503_v28 }
 0x181   : > { %v515_v32 = vadd.f32 %v1338_v30, %v2021_v25  ;;  %v1370_v33 = vpop.f32.mrb[2].mxu1  ;;  %v506_v34 = vpop.f32.mrb[3].mxu0  ;;  %v752_v40 = vadd.f32 %v2026_v27, %v751_v29 }
 0x182   : > { %v763_v37 = vadd.f32 %v1370_v33, %v2026_v27  ;;  %v507_v38 = vadd.f32 %v2021_v25, %v506_v34  ;;  %v754_v39 = vpop.f32.mrb[3].mxu1 }
 0x183   : > { %v1201_v41 = vpack.c.bf16 %v515_v32, %v512_v31  ;;  %v755_v42 = vadd.f32 %v2026_v27, %v754_v39 }
 0x184   : > { %v1241_v43 = vpack.c.bf16 %v763_v37, %v760_v35  ;;  %v1196_v44 = vpack.c.bf16 %v507_v38, %v504_v36 }
 0x185   : > { %1273 = vst [vmem:[%s2037_s8 + $0x8] sm:$0xff] %v1201_v41   ;;  %v1236_v45 = vpack.c.bf16 %v755_v42, %v752_v40 }
 0x186   : > { %1280 = vst [vmem:[%s2041_s17 + $0x8] sm:$0xff] %v1241_v43   ;;  %1197 = vst [vmem:[%s2037_s8] sm:$0xff] %v1196_v44   ;;  %v1341_v46 = vpop.f32.mrb[4].mxu0 }
 0x187   : > { %1237 = vst [vmem:[%s2041_s17] sm:$0xff] %v1236_v45   ;;  %v1373_v47 = vpop.f32.mrb[4].mxu1  ;;  %v519_v48 = vpop.f32.mrb[5].mxu0  ;;  %v528_v51 = vadd.f32 %v1341_v46, %v2021_v25 }
 0x188   : > { %v767_v49 = vpop.f32.mrb[5].mxu1  ;;  %v1342_v50 = vpop.f32.mrb[6].mxu0  ;;  %v776_v55 = vadd.f32 %v1373_v47, %v2026_v27  ;;  %v520_v56 = vadd.f32 %v2021_v25, %v519_v48 }
 0x189   : > { %v531_v52 = vadd.f32 %v1342_v50, %v2021_v25  ;;  %v1374_v53 = vpop.f32.mrb[6].mxu1  ;;  %v522_v54 = vpop.f32.mrb[7].mxu0  ;;  %v768_v60 = vadd.f32 %v2026_v27, %v767_v49 }
 0x18a   : > { %v779_v57 = vadd.f32 %v1374_v53, %v2026_v27  ;;  %v523_v58 = vadd.f32 %v2021_v25, %v522_v54  ;;  %v770_v59 = vpop.f32.mrb[7].mxu1 }
 0x18b   : > { %v1211_v61 = vpack.c.bf16 %v531_v52, %v528_v51  ;;  %v771_v62 = vadd.f32 %v2026_v27, %v770_v59 }
 0x18c   : > { %v1251_v63 = vpack.c.bf16 %v779_v57, %v776_v55  ;;  %v1206_v0 = vpack.c.bf16 %v523_v58, %v520_v56 }
 0x18d   : > { %1275 = vst [vmem:[%s2037_s8 + $0x18] sm:$0xff] %v1211_v61   ;;  %v1246_v1 = vpack.c.bf16 %v771_v62, %v768_v60 }
 0x18e   : > { %1282 = vst [vmem:[%s2041_s17 + $0x18] sm:$0xff] %v1251_v63   ;;  %1274 = vst [vmem:[%s2037_s8 + $0x10] sm:$0xff] %v1206_v0   ;;  %v1345_v2 = vpop.f32.mrb[8].mxu0 }
 0x18f   : > { %1281 = vst [vmem:[%s2041_s17 + $0x10] sm:$0xff] %v1246_v1   ;;  %v1377_v3 = vpop.f32.mrb[8].mxu1  ;;  %v535_v4 = vpop.f32.mrb[9].mxu0  ;;  %v544_v7 = vadd.f32 %v1345_v2, %v2021_v25 }
 0x190   : > { %v783_v5 = vpop.f32.mrb[9].mxu1  ;;  %v1346_v6 = vpop.f32.mrb[10].mxu0  ;;  %v792_v11 = vadd.f32 %v1377_v3, %v2026_v27  ;;  %v536_v12 = vadd.f32 %v2021_v25, %v535_v4 }
 0x191   : > { %v547_v8 = vadd.f32 %v1346_v6, %v2021_v25  ;;  %v1378_v9 = vpop.f32.mrb[10].mxu1  ;;  %v538_v10 = vpop.f32.mrb[11].mxu0  ;;  %v784_v16 = vadd.f32 %v2026_v27, %v783_v5 }
 0x192   : > { %v795_v13 = vadd.f32 %v1378_v9, %v2026_v27  ;;  %v539_v14 = vadd.f32 %v2021_v25, %v538_v10  ;;  %v786_v15 = vpop.f32.mrb[11].mxu1 }
 0x193   : > { %v1221_v17 = vpack.c.bf16 %v547_v8, %v544_v7  ;;  %v787_v18 = vadd.f32 %v2026_v27, %v786_v15 }
 0x194   : > { %v1261_v19 = vpack.c.bf16 %v795_v13, %v792_v11  ;;  %v1216_v20 = vpack.c.bf16 %v539_v14, %v536_v12 }
 0x195   : > { %1277 = vst [vmem:[%s2037_s8 + $0x28] sm:$0xff] %v1221_v17   ;;  %v1256_v21 = vpack.c.bf16 %v787_v18, %v784_v16 }
 0x196   : > { %1284 = vst [vmem:[%s2041_s17 + $0x28] sm:$0xff] %v1261_v19   ;;  %1276 = vst [vmem:[%s2037_s8 + $0x20] sm:$0xff] %v1216_v20   ;;  %v1349_v22 = vpop.f32.mrb[12].mxu0 }
 0x197   : > { %1283 = vst [vmem:[%s2041_s17 + $0x20] sm:$0xff] %v1256_v21   ;;  %v1381_v23 = vpop.f32.mrb[12].mxu1  ;;  %v551_v24 = vpop.f32.mrb[13].mxu0  ;;  %v560_v29 = vadd.f32 %v1349_v22, %v2021_v25 }
 0x198   : > { %v799_v26 = vpop.f32.mrb[13].mxu1  ;;  %v1350_v28 = vpop.f32.mrb[14].mxu0  ;;  %v808_v33 = vadd.f32 %v1381_v23, %v2026_v27  ;;  %v552_v34 = vadd.f32 %v2021_v25, %v551_v24 }
 0x199   : > { %v563_v30 = vadd.f32 %v1350_v28, %v2021_v25  ;;  %v1382_v31 = vpop.f32.mrb[14].mxu1  ;;  %v554_v32 = vpop.f32.mrb[15].mxu0  ;;  %v800_v38 = vadd.f32 %v2026_v27, %v799_v26 }
 0x19a   : > { %v811_v35 = vadd.f32 %v1382_v31, %v2026_v27  ;;  %v555_v36 = vadd.f32 %v2021_v25, %v554_v32  ;;  %v802_v37 = vpop.f32.mrb[15].mxu1 }
 0x19b   : > { %v1231_v39 = vpack.c.bf16 %v563_v30, %v560_v29  ;;  %v803_v40 = vadd.f32 %v2026_v27, %v802_v37 }
 0x19c   : > { %v1271_v41 = vpack.c.bf16 %v811_v35, %v808_v33  ;;  %v1226_v42 = vpack.c.bf16 %v555_v36, %v552_v34 }
 0x19d   : > { %1279 = vst [vmem:[%s2037_s8 + $0x38] sm:$0xff] %v1231_v39   ;;  %v1266_v43 = vpack.c.bf16 %v803_v40, %v800_v38 }
 0x19e   : > { %1286 = vst [vmem:[%s2041_s17 + $0x38] sm:$0xff] %v1271_v41   ;;  %1278 = vst [vmem:[%s2037_s8 + $0x30] sm:$0xff] %v1226_v42  }
 0x19f   : > { %1285 = vst [vmem:[%s2041_s17 + $0x30] sm:$0xff] %v1266_v43  }
 0x1a0   : > { %1614 = shalt.err (!%p1611_p7)
}
 0x1a1   : > { %s1615_s8 = scalar_lea.hbm %s2092_s21, 1024  ;;  %s1619_s24 = scalar_lea.hbm %s2231_s6, 4096 }
 0x1a2   : > { %p1616_p12 = scmp.ne.s32.totalorder %s2092_s21, %s1615_s8  ;;  %p1620_p5 = scmp.lt.u32.totalorder %s2092_s21, %s2231_s6 }
 0x1a3   : > { %p1621_p9 = scmp.lt.u32.totalorder %s1619_s24, %s1615_s8  ;;  %p1623_p4 = scmp.lt.u32.totalorder %s1615_s8, %s2092_s21 }
 0x1a4   : > { %p1617_p1 = pnand %p1616_p12, %p1929_p8 }
 0x1a5   : > { %p1622_p0 = por %p1621_p9, %p1620_p5 }
 0x1a6   : > { %p1618_p2 = pneg %p1617_p1 }
 0x1a7   : > { %p1624_p10 = por %p1623_p4, %p1622_p0 }
 0x1a9   : > { %p1625_p6 = pnand %p1624_p10, %p1618_p2 }
 0x1ab   : > { %1628 = shalt.err (!%p1625_p6)
}
 0x1ac   : > { %s1743_s3 = smov 64   ;;  %s1744_s20 = smov 4  }
 0x1ad   : > { %1393 = dma.vmem_to_hbm [thread:$0]  (%p1929_p8), %s2079_s30, 1024, %s2092_s21, %s895_s9, %s1743_s3, %s1743_s3, %s1744_s20  }
 0x1ae   : > { %s900_s11 = scalar_lea.sflag [#allocation10], %s1993_s18  ;;  %s1629_s16 = scalar_lea.vmem %s2081_s12, 1024 }
 0x1af   : > { %p1630_p11 = scmp.ne.s32.totalorder %s2081_s12, %s1629_s16  ;;  %s1745_s10 = smov [#allocation9]  }
 0x1b0   : > { %s1633_s19 = sshll.u32 %s1745_s10, 4  ;;  %s1634_s19 = int_to_ptr.vmem [resolvable:$false] %s1633_s19 }
 0x1b1   : > { %p1631_p13 = pnand %p1630_p11, %p1929_p8  ;;  %s1635_s8 = scalar_lea.vmem %s1634_s19, 2048 }
 0x1b2   : > { %p1636_p7 = scmp.lt.s32.totalorder %s2081_s12, %s1634_s19  ;;  %p1637_p12 = scmp.lt.s32.totalorder %s1635_s8, %s1629_s16 }
 0x1b3   : > { %p1632_p3 = pneg %p1631_p13 }
 0x1b4   : > { %p1638_p1 = por %p1637_p12, %p1636_p7 }
 0x1b6   : > { %p1639_p2 = pnand %p1638_p1, %p1632_p3 }
 0x1b8   : > { %1642 = shalt.err (!%p1639_p2)
}
 0x1b9   : > { %s1643_s30 = scalar_lea.hbm %s2098_s7, 1024  ;;  %s1647_s17 = scalar_lea.hbm %s2232_s5, 4096 }
 0x1ba   : > { %p1644_p5 = scmp.ne.s32.totalorder %s2098_s7, %s1643_s30  ;;  %p1648_p4 = scmp.lt.u32.totalorder %s2098_s7, %s2232_s5 }
 0x1bb   : > { %p1649_p10 = scmp.lt.u32.totalorder %s1647_s17, %s1643_s30  ;;  %p1651_p11 = scmp.lt.u32.totalorder %s1643_s30, %s2098_s7 }
 0x1bc   : > { %p1645_p9 = pnand %p1644_p5, %p1929_p8 }
 0x1bd   : > { %p1650_p6 = por %p1649_p10, %p1648_p4 }
 0x1be   : > { %p1646_p0 = pneg %p1645_p9 }
 0x1bf   : > { %p1652_p13 = por %p1651_p11, %p1650_p6 }
 0x1c1   : > { %p1653_p3 = pnand %p1652_p13, %p1646_p0 }
 0x1c3   : > { %1656 = shalt.err (!%p1653_p3)
}
 0x1c4   : > { %1394 = dma.vmem_to_hbm [thread:$0]  (%p1929_p8), %s2081_s12, 1024, %s2098_s7, %s900_s11, %s1743_s3, %s1743_s3, %s1744_s20  }
 0x1c5 PF: > { %s2233_s15 = sld [smem:[#allocation15_spill]]  ;;  %s2234_s13 = sld [smem:[#allocation16_spill]] }
 0x1c6   : > { %p1420_p7 = scmp.ge.s32.totalorder %s1735_s28, 2 }
 0x1cb   : > { %s948_s16 = sand.u32 1, %s2233_s15   ;;  %p2235_p12 = scmp.ne.s32.totalorder %s2234_s13, 0 }
 0x1cc   : > { %s949_s10 = scalar_lea.sflag [#allocation4], %s948_s16 }
 0x1cd   : > { %p1409_p1 = pnand %p1420_p7, %p2235_p12 }
 0x1cf   : > { %1698 = dma.done.wait (!%p1409_p1), %s949_s10, 1024  }
 0x1d0   : > { %1700 = vsyncadd (!%p1409_p1), %s949_s10, 4294966272  ;;  %s958_s25 = scalar_lea.sflag [#allocation10], %s948_s16 }
 0x1d1   : > { %1702 = dma.done.wait (!%p1409_p1), %s958_s25, 1024  }
 0x1d2   : > { %1704 = vsyncadd (!%p1409_p1), %s958_s25, 4294966272  ;;  %s27_s28 = sadd.s32 1, %s1735_s28   ;;  %s2236_s18 = sld [smem:[#allocation17_spill]] }
 0x1d3   : > { %p24_p2 = scmp.ge.s32.totalorder %s27_s28, 6   ;;  %s2237_s21 = smov %s1711_s22 }
 0x1d4   : > { %s2238_s22 = smov %s1715_s23  ;;  %s2239_s23 = smov %s1942_s1 }
 0x1d5   : > { %s2240_s24 = smov %s1727_s26  ;;  %s2241_s25 = smov %s1731_s27 }
 0x1d6   : > { %s2243_s27 = smov %s2249_s14  ;;  %26 = sbr.rel (!%p24_p2) target bundleno = 15 (0xf), region = 110 }
 0x1d8   : > { %s2242_s26 = smov %s2236_s18 }
 0x1dd   :  { %963 = vsyncpa [#allocation3], 1 }
 0x1de   :  { %965 = vsyncpa [#allocation3 + $0x1], 1 }
 0x1df   :  { %966 = vsyncpa [#allocation6], 1 }
 0x1e0   :  { %967 = vsyncpa [#allocation4], 1 }
 0x1e1   :  { %969 = vsyncpa [#allocation4 + $0x1], 1 }
 0x1e2   :  { %970 = vsyncpa [#allocation10], 1 }
 0x1e3   :  { %972 = vsyncpa [#allocation10 + $0x1], 1 }

</bundles_post_ra>
